<compile_context>
chip_gen: v5e
topology: v5e:2x2
jax: 0.10.0
libtpu: 0.0.40
codegen_flags: <defaults>
</compile_context>

<pallas_src>
import functools
import math

import jax
import jax.numpy as jnp
from jax.experimental import pallas as pl
from jax.experimental.pallas import tpu as pltpu

EPSILON = 1e-16
_LANES = 128
_MAX_ROWS_PER_CHUNK = 4096          # 4096 * 128 * 4 B = 2 MiB per f32 input block
_NEG_INF = float(jnp.finfo(jnp.float32).min)


def _round_up(x, m):
    return -(-x // m) * m


# --------------------------- pass 1: per-batch max ---------------------------

def _batch_max_kernel(x_ref, m_ref, *, n_valid, rows_per_chunk, need_mask):
    c = pl.program_id(1)

    @pl.when(c == 0)
    def _():
        m_ref[...] = jnp.full_like(m_ref, _NEG_INF)

    x = x_ref[...].astype(jnp.float32)                      # (1, rc, 128)
    if need_mask:
        # Mask flat-index padding (only generated when padding exists).
        sub = jax.lax.broadcasted_iota(jnp.int32, x.shape, 1)
        lane = jax.lax.broadcasted_iota(jnp.int32, x.shape, 2)
        flat_id = (c * rows_per_chunk + sub) * _LANES + lane
        x = jnp.where(flat_id < n_valid, x, _NEG_INF)
    # sublane-only reduce; lane-wise running max lives in the output block
    m_ref[...] = jnp.maximum(m_ref[...], jnp.max(x, axis=1, keepdims=True))


# ---------------------- pass 2: weighted squared error -----------------------

def _sphere_mse_kernel(inv_ref, x_ref, t_ref, w_ref, part_ref):
    c = pl.program_id(1)

    @pl.when(c == 0)
    def _():
        part_ref[...] = jnp.zeros_like(part_ref)

    x = x_ref[...].astype(jnp.float32)                      # (1, rc, 128)
    t = t_ref[...].astype(jnp.float32)                      # (1, rc, 128)
    w = w_ref[...].astype(jnp.float32)                      # (rc, 128)
    inv = inv_ref[...]                                      # (1, 1, 128) = 1/(max+eps)

    d = x * inv - t                                         # multiply, not divide
    # padded elements have x = t = w = 0 -> zero contribution
    part_ref[...] += jnp.sum(d * d * w[None, :, :], axis=1, keepdims=True)


# --------------------------------- wrapper -----------------------------------

def make_sphere_weight(h, w, dtype=jnp.float32):
    """Deterministic (h, w) weight identical to the PyTorch __init__."""
    theta = jnp.linspace(0.0, math.pi, h + 1)
    dtheta = math.pi / h
    dphi = 2.0 * math.pi / w
    row = dphi * (jnp.sin(theta[:h]) + jnp.sin(theta[1:])) / 2.0 * dtheta   # (h,)
    return jnp.broadcast_to(row[:, None], (h, w)).astype(dtype)


@jax.jit
def sphere_mse(out, target, weight):
    B, C, H, W = out.shape
    assert target.shape == out.shape
    assert weight.shape == (H, W)

    N = C * H * W
    R = -(-N // _LANES)                                   # lane-rows per batch
    n_chunks = -(-R // _MAX_ROWS_PER_CHUNK)
    rows_per_chunk = _round_up(-(-R // n_chunks), 8)      # sublane-aligned
    R_pad = rows_per_chunk * n_chunks
    N_pad = R_pad * _LANES
    need_mask = (N_pad != N)

    def to_lane_dense(a):
        flat = a.reshape(B, N).astype(jnp.float32)
        if need_mask:
            flat = jnp.pad(flat, ((0, 0), (0, N_pad - N)))
        return flat.reshape(B, R_pad, _LANES)

    out3 = to_lane_dense(out)
    tgt3 = to_lane_dense(target)

    w_flat = jnp.tile(weight.reshape(-1).astype(jnp.float32), (C,))        # (N,)
    if need_mask:
        w_flat = jnp.pad(w_flat, (0, N_pad - N))
    w3 = w_flat.reshape(R_pad, _LANES)

    cparams = pltpu.CompilerParams(
        dimension_semantics=("parallel", "arbitrary"),
        vmem_limit_bytes=32 * 1024 * 1024,
    )

    # ---- pass 1: per-batch max of `out` ----
    max_part = pl.pallas_call(
        functools.partial(_batch_max_kernel, n_valid=N,
                          rows_per_chunk=rows_per_chunk, need_mask=need_mask),
        out_shape=jax.ShapeDtypeStruct((B, 1, _LANES), jnp.float32),
        grid_spec=pltpu.PrefetchScalarGridSpec(
            num_scalar_prefetch=0,
            grid=(B, n_chunks),
            in_specs=[
                pl.BlockSpec((1, rows_per_chunk, _LANES), lambda b, c: (b, c, 0)),
            ],
            out_specs=pl.BlockSpec((1, 1, _LANES), lambda b, c: (b, 0, 0)),
        ),
        compiler_params=cparams,
    )(out3)

    m_b = jnp.max(max_part, axis=(1, 2))                  # (B,) per-batch max
    inv3 = jnp.broadcast_to((1.0 / (m_b + EPSILON))[:, None, None],
                            (B, 1, _LANES))

    # ---- pass 2: weighted squared error, per-batch lane partials ----
    parts = pl.pallas_call(
        _sphere_mse_kernel,
        out_shape=jax.ShapeDtypeStruct((B, 1, _LANES), jnp.float32),
        grid_spec=pltpu.PrefetchScalarGridSpec(
            num_scalar_prefetch=0,
            grid=(B, n_chunks),
            in_specs=[
                pl.BlockSpec((1, 1, _LANES), lambda b, c: (b, 0, 0)),              # inv
                pl.BlockSpec((1, rows_per_chunk, _LANES), lambda b, c: (b, c, 0)),  # out
                pl.BlockSpec((1, rows_per_chunk, _LANES), lambda b, c: (b, c, 0)),  # target
                pl.BlockSpec((rows_per_chunk, _LANES), lambda b, c: (c, 0)),        # weight
            ],
            out_specs=pl.BlockSpec((1, 1, _LANES), lambda b, c: (b, 0, 0)),
        ),
        compiler_params=cparams,
    )(inv3, out3, tgt3, w3)

    return jnp.sum(parts) / B


def sphere_mse_ref(out, target, weight):
    B = out.shape[0]
    m = jnp.max(out.reshape(B, -1), axis=-1).reshape(B, 1, 1, 1)
    outn = out / (m + EPSILON)
    w4 = weight[None, None, :, :]
    return jnp.sum((outn - target) ** 2 * w4) / B


if __name__ == "__main__":
    B, C, H, W = 2, 4, 16, 16

    key = jax.random.PRNGKey(0)
    k1, k2 = jax.random.split(key)
    out = jax.random.uniform(k1, (B, C, H, W), dtype=jnp.float32)
    target = jax.random.uniform(k2, (B, C, H, W), dtype=jnp.float32)

    weight = make_sphere_weight(H, W)

    loss = sphere_mse(out, target, weight)
    jax.block_until_ready(loss)

    ref = sphere_mse_ref(out, target, weight)
    assert jnp.allclose(loss, ref, rtol=1e-5, atol=1e-6), (loss, ref)

    print("KERNEL_OK")
</pallas_src>

<mosaic_0001>
module attributes {stable_mosaic.version = 11 : i64} {
  func.func @_sphere_mse_kernel(%arg0: i32, %arg1: i32, %arg2: memref<1x1x128xf32, #tpu.memory_space<vmem>>, %arg3: memref<1x8x128xf32, #tpu.memory_space<vmem>>, %arg4: memref<1x8x128xf32, #tpu.memory_space<vmem>>, %arg5: memref<8x128xf32, #tpu.memory_space<vmem>>, %arg6: memref<1x1x128xf32, #tpu.memory_space<vmem>>) attributes {dimension_semantics = [#tpu.dimension_semantics<parallel>, #tpu.dimension_semantics<arbitrary>], iteration_bounds = array<i64: 2, 1>, scalar_prefetch = 0 : i64, scratch_operands = 0 : i64, tpu.core_type = #tpu.core_type<tc>, window_params = [{transform_indices = @transform_0, window_bounds = array<i64: 1, 1, 128>}, {transform_indices = @transform_1, window_bounds = array<i64: 1, 8, 128>}, {transform_indices = @transform_2, window_bounds = array<i64: 1, 8, 128>}, {transform_indices = @transform_3, window_bounds = array<i64: 8, 128>}, {transform_indices = @transform_4, window_bounds = array<i64: 1, 1, 128>}]} {
    %c0_i32 = arith.constant 0 : i32
    %0 = arith.cmpi eq, %arg1, %c0_i32 : i32
    %1 = arith.extui %0 : i1 to i32
    %c0_i32_0 = arith.constant 0 : i32
    %2 = arith.cmpi ne, %1, %c0_i32_0 : i32
    scf.if %2 {
      %cst_17 = arith.constant 0.000000e+00 : f32
      %18 = vector.broadcast %cst_17 : f32 to vector<1x1x128xf32>
      %c0_18 = arith.constant 0 : index
      %c0_19 = arith.constant 0 : index
      %c0_20 = arith.constant 0 : index
      %19 = vector.load %arg6[%c0_18, %c0_19, %c0_20] : memref<1x1x128xf32, #tpu.memory_space<vmem>>, vector<1x1x128xf32>
      tpu.vector_store %arg6[%c0_18, %c0_19, %c0_20], %18 {strides = array<i32>} : memref<1x1x128xf32, #tpu.memory_space<vmem>>, vector<1x1x128xf32>,
    } else {
    }
    %c0 = arith.constant 0 : index
    %c0_1 = arith.constant 0 : index
    %c0_2 = arith.constant 0 : index
    %3 = vector.load %arg3[%c0, %c0_1, %c0_2] : memref<1x8x128xf32, #tpu.memory_space<vmem>>, vector<1x8x128xf32>
    %c0_3 = arith.constant 0 : index
    %c0_4 = arith.constant 0 : index
    %c0_5 = arith.constant 0 : index
    %4 = vector.load %arg4[%c0_3, %c0_4, %c0_5] : memref<1x8x128xf32, #tpu.memory_space<vmem>>, vector<1x8x128xf32>
    %c0_6 = arith.constant 0 : index
    %c0_7 = arith.constant 0 : index
    %5 = vector.load %arg5[%c0_6, %c0_7] : memref<8x128xf32, #tpu.memory_space<vmem>>, vector<8x128xf32>
    %c0_8 = arith.constant 0 : index
    %c0_9 = arith.constant 0 : index
    %c0_10 = arith.constant 0 : index
    %6 = vector.load %arg2[%c0_8, %c0_9, %c0_10] : memref<1x1x128xf32, #tpu.memory_space<vmem>>, vector<1x1x128xf32>
    %7 = vector.broadcast %6 : vector<1x1x128xf32> to vector<1x8x128xf32>
    %8 = arith.mulf %3, %7 : vector<1x8x128xf32>
    %9 = arith.subf %8, %4 : vector<1x8x128xf32>
    %c0_11 = arith.constant 0 : index
    %c0_12 = arith.constant 0 : index
    %c0_13 = arith.constant 0 : index
    %10 = vector.load %arg6[%c0_11, %c0_12, %c0_13] : memref<1x1x128xf32, #tpu.memory_space<vmem>>, vector<1x1x128xf32>
    %11 = arith.mulf %9, %9 : vector<1x8x128xf32>
    %12 = vector.shape_cast %5 : vector<8x128xf32> to vector<1x8x128xf32>
    %13 = arith.mulf %11, %12 : vector<1x8x128xf32>
    %cst = arith.constant dense<0.000000e+00> : vector<1x128xf32>
    %14 = vector.multi_reduction <add>, %13, %cst [1] : vector<1x8x128xf32> to vector<1x128xf32>
    %15 = vector.shape_cast %14 : vector<1x128xf32> to vector<1x1x128xf32>
    %16 = arith.addf %10, %15 : vector<1x1x128xf32>
    %c0_14 = arith.constant 0 : index
    %c0_15 = arith.constant 0 : index
    %c0_16 = arith.constant 0 : index
    %17 = vector.load %arg6[%c0_14, %c0_15, %c0_16] : memref<1x1x128xf32, #tpu.memory_space<vmem>>, vector<1x1x128xf32>
    tpu.vector_store %arg6[%c0_14, %c0_15, %c0_16], %16 {strides = array<i32>} : memref<1x1x128xf32, #tpu.memory_space<vmem>>, vector<1x1x128xf32>,
    return
  }
  func.func @transform_0(%arg0: i32, %arg1: i32) -> (i32, i32, i32) {
    %c0_i32 = arith.constant 0 : i32
    %c0_i32_0 = arith.constant 0 : i32
    %c0_i32_1 = arith.constant 0 : i32
    return %arg0, %c0_i32, %c0_i32_0 : i32, i32, i32
  }
  func.func @transform_1(%arg0: i32, %arg1: i32) -> (i32, i32, i32) {
    %c0_i32 = arith.constant 0 : i32
    %c0_i32_0 = arith.constant 0 : i32
    return %arg0, %arg1, %c0_i32 : i32, i32, i32
  }
  func.func @transform_2(%arg0: i32, %arg1: i32) -> (i32, i32, i32) {
    %c0_i32 = arith.constant 0 : i32
    %c0_i32_0 = arith.constant 0 : i32
    return %arg0, %arg1, %c0_i32 : i32, i32, i32
  }
  func.func @transform_3(%arg0: i32, %arg1: i32) -> (i32, i32) {
    %c0_i32 = arith.constant 0 : i32
    %c0_i32_0 = arith.constant 0 : i32
    return %arg1, %c0_i32 : i32, i32
  }
  func.func @transform_4(%arg0: i32, %arg1: i32) -> (i32, i32, i32) {
    %c0_i32 = arith.constant 0 : i32
    %c0_i32_0 = arith.constant 0 : i32
    %c0_i32_1 = arith.constant 0 : i32
    return %arg0, %c0_i32, %c0_i32_0 : i32, i32, i32
  }
}

module attributes {stable_mosaic.version = 11 : i64} {
  func.func @_batch_max_kernel(%arg0: i32, %arg1: i32, %arg2: memref<1x8x128xf32, #tpu.memory_space<vmem>>, %arg3: memref<1x1x128xf32, #tpu.memory_space<vmem>>) attributes {dimension_semantics = [#tpu.dimension_semantics<parallel>, #tpu.dimension_semantics<arbitrary>], iteration_bounds = array<i64: 2, 1>, scalar_prefetch = 0 : i64, scratch_operands = 0 : i64, tpu.core_type = #tpu.core_type<tc>, window_params = [{transform_indices = @transform_0, window_bounds = array<i64: 1, 8, 128>}, {transform_indices = @transform_1, window_bounds = array<i64: 1, 1, 128>}]} {
    %c0_i32 = arith.constant 0 : i32
    %0 = arith.cmpi eq, %arg1, %c0_i32 : i32
    %1 = arith.extui %0 : i1 to i32
    %c0_i32_0 = arith.constant 0 : i32
    %2 = arith.cmpi ne, %1, %c0_i32_0 : i32
    scf.if %2 {
      %cst_9 = arith.constant -3.40282347E+38 : f32
      %9 = vector.broadcast %cst_9 : f32 to vector<1x1x128xf32>
      %c0_10 = arith.constant 0 : index
      %c0_11 = arith.constant 0 : index
      %c0_12 = arith.constant 0 : index
      %10 = vector.load %arg3[%c0_10, %c0_11, %c0_12] : memref<1x1x128xf32, #tpu.memory_space<vmem>>, vector<1x1x128xf32>
      tpu.vector_store %arg3[%c0_10, %c0_11, %c0_12], %9 {strides = array<i32>} : memref<1x1x128xf32, #tpu.memory_space<vmem>>, vector<1x1x128xf32>,
    } else {
    }
    %c0 = arith.constant 0 : index
    %c0_1 = arith.constant 0 : index
    %c0_2 = arith.constant 0 : index
    %3 = vector.load %arg2[%c0, %c0_1, %c0_2] : memref<1x8x128xf32, #tpu.memory_space<vmem>>, vector<1x8x128xf32>
    %c0_3 = arith.constant 0 : index
    %c0_4 = arith.constant 0 : index
    %c0_5 = arith.constant 0 : index
    %4 = vector.load %arg3[%c0_3, %c0_4, %c0_5] : memref<1x1x128xf32, #tpu.memory_space<vmem>>, vector<1x1x128xf32>
    %cst = arith.constant dense<0xFF800000> : vector<1x128xf32>
    %5 = vector.multi_reduction <maximumf>, %3, %cst [1] : vector<1x8x128xf32> to vector<1x128xf32>
    %6 = vector.shape_cast %5 : vector<1x128xf32> to vector<1x1x128xf32>
    %7 = arith.maximumf %4, %6 : vector<1x1x128xf32>
    %c0_6 = arith.constant 0 : index
    %c0_7 = arith.constant 0 : index
    %c0_8 = arith.constant 0 : index
    %8 = vector.load %arg3[%c0_6, %c0_7, %c0_8] : memref<1x1x128xf32, #tpu.memory_space<vmem>>, vector<1x1x128xf32>
    tpu.vector_store %arg3[%c0_6, %c0_7, %c0_8], %7 {strides = array<i32>} : memref<1x1x128xf32, #tpu.memory_space<vmem>>, vector<1x1x128xf32>,
    return
  }
  func.func @transform_0(%arg0: i32, %arg1: i32) -> (i32, i32, i32) {
    %c0_i32 = arith.constant 0 : i32
    %c0_i32_0 = arith.constant 0 : i32
    return %arg0, %arg1, %c0_i32 : i32, i32, i32
  }
  func.func @transform_1(%arg0: i32, %arg1: i32) -> (i32, i32, i32) {
    %c0_i32 = arith.constant 0 : i32
    %c0_i32_0 = arith.constant 0 : i32
    %c0_i32_1 = arith.constant 0 : i32
    return %arg0, %c0_i32, %c0_i32_0 : i32, i32, i32
  }
}

</mosaic_0001>

<bundles_post_ra>
// kernel: sphere_mse.3
= control target key start
LH: loop header
LB: loop body
LE: loop exit
PB: predicated region body
PF: predicated region fallthrough
CT: control target
= control target key end

     0   :  { %s482_s15 = smov 0   ;;  %s484_s16 = smov 0   ;;  %s524_s0 = inlined_call_operand.vmem [shape: f32[2,1,128], index: 0, kind: input, shape index: {}]   ;;  %s525_s1 = inlined_call_operand.vmem [shape: f32[2,8,128], index: 1, kind: input, shape index: {}]   ;;  %s526_s2 = inlined_call_operand.vmem [shape: f32[2,8,128], index: 2, kind: input, shape index: {}]   ;;  %s527_s3 = inlined_call_operand.vmem [shape: f32[8,128], index: 3, kind: input, shape index: {}]   ;;  %s528_s4 = inlined_call_operand.vmem [shape: f32[2,1,128], index: 4, kind: output, shape index: {}]  }
   0x1   :  { %s486_s17 = smov 0  }
   0x2 LB: > { %s26_s18 = sadd.s32 1, %s450_s16  ;;  %p401_p0 = scmp.ge.s32.totalorder %s454_s17, 1  ;;  %s454_s17 = sphi %s486_s17, %s14_s17   ;;  %s450_s16 = sphi %s484_s16, %s530_s16   ;;  %s446_s15 = sphi %s482_s15, %s529_s15  }
   0x3   : > { %p28_p1 = scmp.ge.s32.totalorder %s26_s18, 2  ;;  %p209_p2 = scmp.lt.s32.totalorder %s454_s17, 3 }
   0x5   : > { %s532_s18 = smov (%p28_p1, %s26_s18), 0  ;;  %p210_p3 = pnand %p401_p0, %p209_p2 }
   0x6   : > { %p249_p4 = scmp.lt.s32.totalorder (!%p210_p3), %s446_s15, 1 }
   0x7   : > { %213 = sbr.rel (%p210_p3) target bundleno = 39 (0x27), region = 36 }
   0xc   : > { %s534_s15 = smov (!%p249_p4, %s446_s15), 1  ;;  %v456_v3 = vmov 0.0   ;;  %v280_v6 = vld [vmem:[%s527_s3] sm:$0xff] }
   0xd   : > { %s251_s21 = scalar_lea.vmem %s524_s0, %s534_s15  ;;  %s402_s22 = sshll.u32 %s534_s15, 3 }
   0xe   : > { %s258_s25 = scalar_lea.vmem %s525_s1, %s402_s22  ;;  %s265_s28 = scalar_lea.vmem %s526_s2, %s402_s22  ;;  %v431_v0 = vld [vmem:[%s251_s21] ss:$0 sm:$0xff] }
   0xf   : > { %s272_s5 = scalar_lea.vmem %s528_s4, %s534_s15  ;;  %v278_v1 = vld [vmem:[%s258_s25] sm:$0xff] }
  0x10   : > { %v279_v2 = vld [vmem:[%s265_s28] sm:$0xff]  ;;  %277 = vst [vmem:[%s272_s5] sm:$0x1] %v456_v3  ;;  %v285_v4 = vmul.f32 %v431_v0, %v278_v1 }
  0x12   : > { %v286_v5 = vsub.f32 %v285_v4, %v279_v2 }
  0x14   : > { %v288_v7 = vmul.f32 %v286_v5, %v286_v5 }
  0x16   : > { %v289_v8 = vmul.f32 %v288_v7, %v280_v6 }
  0x17   : > { %v287_v14 = vld [vmem:[%s272_s5] sm:$0x1] }
  0x18   : > { %v290_v9 = vrot.slane %v289_v8, 4 }
  0x1a   : > { %v291_v10 = vadd.f32 %v290_v9, %v289_v8 }
  0x1c   : > { %v292_v11 = vrot.slane %v291_v10, 2 }
  0x1e   : > { %v293_v12 = vadd.f32 %v292_v11, %v291_v10 }
  0x20   : > { %v294_v13 = vrot.slane %v293_v12, 1 }
  0x22   : > { %v295_v15 = vadd.f32 %v294_v13, %v293_v12 }
  0x24   : > { %v296_v16 = vadd.f32 %v295_v15, %v287_v14 }
  0x26   : > { %297 = vst [vmem:[%s272_s5] sm:$0x1] %v296_v16 }
  0x27 PF: > { %s14_s17 = sadd.s32 1, %s454_s17   ;;  %s529_s15 = smov %s450_s16 }
  0x28   : > { %p11_p5 = scmp.ge.s32.totalorder %s14_s17, 4   ;;  %s530_s16 = smov %s532_s18 }
  0x2a   :  { %13 = sbr.rel (!%p11_p5) target bundleno = 2 (0x2), region = 79 }

// kernel: sphere_mse.2
= control target key start
LH: loop header
LB: loop body
LE: loop exit
PB: predicated region body
PF: predicated region fallthrough
CT: control target
= control target key end

     0   :  { %s274_s6 = smov 0   ;;  %s276_s7 = smov 0   ;;  %s300_s0 = inlined_call_operand.vmem [shape: f32[2,8,128], index: 0, kind: input, shape index: {}]   ;;  %s301_s1 = inlined_call_operand.vmem [shape: f32[2,1,128], index: 1, kind: output, shape index: {}]  }
   0x1   :  { %s278_s8 = smov 0  }
   0x2 LB: > { %s23_s9 = sadd.s32 1, %s257_s7  ;;  %p210_p0 = scmp.ge.s32.totalorder %s261_s8, 1  ;;  %s261_s8 = sphi %s278_s8, %s11_s8   ;;  %s257_s7 = sphi %s276_s7, %s303_s7   ;;  %s253_s6 = sphi %s274_s6, %s302_s6  }
   0x3   : > { %p25_p1 = scmp.ge.s32.totalorder %s23_s9, 2  ;;  %p103_p2 = scmp.lt.s32.totalorder %s261_s8, 3 }
   0x5   : > { %s305_s9 = smov (%p25_p1, %s23_s9), 0  ;;  %p104_p3 = pnand %p210_p0, %p103_p2 }
   0x6   : > { %p123_p4 = scmp.lt.s32.totalorder (!%p104_p3), %s253_s6, 1 }
   0x7   : > { %107 = sbr.rel (%p104_p3) target bundleno = 31 (0x1f), region = 24 }
   0xc   : > { %s307_s6 = smov (!%p123_p4, %s253_s6), 1  ;;  %v263_v0 = vmov -3.4028235e+38  }
   0xd   : > { %s211_s10 = sshll.u32 %s307_s6, 3  ;;  %s132_s13 = scalar_lea.vmem %s301_s1, %s307_s6 }
   0xe   : > { %s129_s16 = scalar_lea.vmem %s300_s0, %s211_s10  ;;  %137 = vst [vmem:[%s132_s13] sm:$0x1] %v263_v0 }
   0xf   : > { %v138_v1 = vld [vmem:[%s129_s16] sm:$0xff] }
  0x10   : > { %v140_v2 = vrot.slane %v138_v1, 4 }
  0x12   : > { %v141_v3 = vmax.f32 %v138_v1, %v140_v2 }
  0x14   : > { %v142_v4 = vrot.slane %v141_v3, 2 }
  0x15   : > { %v139_v7 = vld [vmem:[%s132_s13] sm:$0x1] }
  0x16   : > { %v143_v5 = vmax.f32 %v141_v3, %v142_v4 }
  0x18   : > { %v144_v6 = vrot.slane %v143_v5, 1 }
  0x1a   : > { %v145_v8 = vmax.f32 %v143_v5, %v144_v6 }
  0x1c   : > { %v146_v9 = vmax.f32 %v139_v7, %v145_v8 }
  0x1e   : > { %147 = vst [vmem:[%s132_s13] sm:$0x1] %v146_v9 }
  0x1f PF: > { %s11_s8 = sadd.s32 1, %s261_s8   ;;  %s302_s6 = smov %s257_s7 }
  0x20   : > { %p8_p5 = scmp.ge.s32.totalorder %s11_s8, 4   ;;  %s303_s7 = smov %s305_s9 }
  0x22   :  { %10 = sbr.rel (!%p8_p5) target bundleno = 2 (0x2), region = 58 }

</bundles_post_ra>
